<compile_context>
chip_gen: v6e
topology: v6e:2x2x1
jax: 0.10.0
libtpu: 0.0.40
codegen_flags: <defaults>
</compile_context>

<pallas_src>
from functools import partial

import jax
import jax.numpy as jnp
from jax.experimental import pallas as pl
from jax.experimental.pallas import tpu as pltpu

_LANES = 128
_ROW_ALIGN = 32  # sublane alignment that also satisfies int8 (32,128) tiling


def _dice_kernel(x_ref, t_ref, out_ref, acc_int, acc_in, acc_tg, *,
                 smooth, hw, tile_rows, num_channels, obj_channel, needs_mask):
    j = pl.program_id(1)
    n_hw = pl.num_programs(1)

    @pl.when(j == 0)
    def _():
        acc_int[...] = jnp.zeros_like(acc_int)
        acc_in[...] = jnp.zeros_like(acc_in)
        acc_tg[...] = jnp.zeros_like(acc_tg)

    # Load each channel as a dense (tile_rows, 128) slab; channel reduction is
    # an unrolled elementwise VPU loop (no cross-sublane XLU reduce, full vregs
    # even for tiny C).
    xs = [x_ref[0, c].astype(jnp.float32) for c in range(num_channels)]
    m = xs[0]
    for c in range(1, num_channels):
        m = jnp.maximum(m, xs[c])
    denom = None
    e_obj = None
    for c in range(num_channels):
        ec = jnp.exp(xs[c] - m)
        denom = ec if denom is None else denom + ec
        if c == obj_channel:
            e_obj = ec
    # Only the foreground channel is used -> one reciprocal of the denominator
    # instead of dividing the full (C, HW) softmax. (approx=True would route
    # this to the EUP at a small precision cost.)
    obj = e_obj * pl.reciprocal(denom, approx=False)

    if needs_mask:
        # Zero out the lanes that correspond to spatial padding.
        rid = jax.lax.broadcasted_iota(jnp.int32, (tile_rows, _LANES), 0)
        lid = jax.lax.broadcasted_iota(jnp.int32, (tile_rows, _LANES), 1)
        flat = (j * tile_rows + rid) * _LANES + lid
        obj = jnp.where(flat < hw, obj, 0.0)

    t = t_ref[0].astype(jnp.float32)  # targets are zero-padded, no mask needed

    # Per-lane partial sums only (plain VPU adds over tile_rows//8 slabs); the
    # cross-lane reduction happens once per sample, in the epilogue.
    g = tile_rows // 8
    acc_int[...] += (obj * t).reshape(g, 8, _LANES).sum(axis=0)
    acc_in[...] += obj.reshape(g, 8, _LANES).sum(axis=0)
    acc_tg[...] += t.reshape(g, 8, _LANES).sum(axis=0)

    @pl.when(j == n_hw - 1)
    def _():
        inter = jnp.sum(acc_int[...])
        s_in = jnp.sum(acc_in[...])
        s_tg = jnp.sum(acc_tg[...])
        loss = 1.0 - (2.0 * inter + smooth) / (s_in + s_tg + smooth)
        out_ref[...] = jnp.broadcast_to(loss, out_ref.shape).astype(out_ref.dtype)


def dice_loss(inputs, targets, smooth=1.0, size_average=True, obj_channel=1,
              tile_lanes=32768):
    """inputs: (N, C, H, W) logits (f32 or bf16); targets: (N, H, W) {0,1} masks."""
    N, C, H, W = inputs.shape
    assert C > obj_channel >= 0, "foreground channel index must exist (needs C >= 2)"
    HW = H * W

    rows = pl.cdiv(HW, _LANES)
    max_tile_rows = max(_ROW_ALIGN,
                        (tile_lanes // _LANES) // _ROW_ALIGN * _ROW_ALIGN)
    tile_rows = min(max_tile_rows, pl.cdiv(rows, _ROW_ALIGN) * _ROW_ALIGN)
    n_hw_tiles = pl.cdiv(rows, tile_rows)
    rows_pad = n_hw_tiles * tile_rows
    hw_pad = rows_pad * _LANES

    x = inputs.reshape(N, C, HW)
    if hw_pad != HW:
        x = jnp.pad(x, ((0, 0), (0, 0), (0, hw_pad - HW)))
    x = x.reshape(N, C, rows_pad, _LANES)

    # Ship targets as int8 (HBM-bound kernel: ~4x less target traffic than f32).
    t = targets.reshape(N, HW).astype(jnp.int8)
    if hw_pad != HW:
        t = jnp.pad(t, ((0, 0), (0, hw_pad - HW)))
    t = t.reshape(N, rows_pad, _LANES)

    out = pl.pallas_call(
        partial(_dice_kernel, smooth=float(smooth), hw=HW,
                tile_rows=tile_rows, num_channels=C, obj_channel=obj_channel,
                needs_mask=(hw_pad != HW)),
        out_shape=jax.ShapeDtypeStruct((N, 8, _LANES), jnp.float32),
        grid_spec=pltpu.PrefetchScalarGridSpec(
            num_scalar_prefetch=0,
            grid=(N, n_hw_tiles),
            in_specs=[
                pl.BlockSpec((1, C, tile_rows, _LANES),
                             lambda n, j: (n, 0, j, 0)),
                pl.BlockSpec((1, tile_rows, _LANES),
                             lambda n, j: (n, j, 0)),
            ],
            out_specs=pl.BlockSpec((1, 8, _LANES), lambda n, j: (n, 0, 0)),
            scratch_shapes=[pltpu.VMEM((8, _LANES), jnp.float32)] * 3,
        ),
        compiler_params=pltpu.CompilerParams(
            # batch axis can be sharded across TensorCores (v7x); the HW-tile
            # axis carries the per-sample accumulator -> arbitrary.
            dimension_semantics=("parallel", "arbitrary"),
            vmem_limit_bytes=32 * 1024 * 1024,
        ),
    )(x, t)

    per_sample = out[:, 0, 0]          # per-sample dice losses
    total = jnp.sum(per_sample)        # final tiny reduction done in JAX
    return total / N if size_average else total


if __name__ == "__main__":
    key = jax.random.PRNGKey(0)
    k1, k2 = jax.random.split(key)

    N, C, H, W = 2, 4, 16, 16
    inputs = jax.random.normal(k1, (N, C, H, W), dtype=jnp.float32)
    targets = (jax.random.uniform(k2, (N, H, W)) > 0.5).astype(jnp.float32)

    loss = dice_loss(inputs, targets, smooth=1.0, size_average=True)
    jax.block_until_ready(loss)

    # pure-JAX reference (mirrors the PyTorch forward exactly)
    p_obj = jax.nn.softmax(inputs, axis=1)[:, 1, :, :]
    iflat = p_obj.reshape(N, -1)
    tflat = targets.reshape(N, -1)
    inter = jnp.sum(iflat * tflat, axis=-1)
    per_sample = 1.0 - (2.0 * inter + 1.0) / (
        jnp.sum(iflat, axis=-1) + jnp.sum(tflat, axis=-1) + 1.0)
    ref = jnp.sum(per_sample) / N

    assert jnp.allclose(loss, ref, rtol=1e-4, atol=1e-5), (loss, ref)
    print("KERNEL_OK")
</pallas_src>

<mosaic_0001>
module attributes {stable_mosaic.version = 11 : i64} {
  func.func @_dice_kernel(%arg0: i32, %arg1: i32, %arg2: memref<1x4x32x128xf32, #tpu.memory_space<vmem>>, %arg3: memref<1x32x128xi8, #tpu.memory_space<vmem>>, %arg4: memref<1x8x128xf32, #tpu.memory_space<vmem>>, %arg5: memref<8x128xf32, #tpu.memory_space<vmem>>, %arg6: memref<8x128xf32, #tpu.memory_space<vmem>>, %arg7: memref<8x128xf32, #tpu.memory_space<vmem>>) attributes {dimension_semantics = [#tpu.dimension_semantics<parallel>, #tpu.dimension_semantics<arbitrary>], iteration_bounds = array<i64: 2, 1>, scalar_prefetch = 0 : i64, scratch_operands = 3 : i64, tpu.core_type = #tpu.core_type<tc>, window_params = [{transform_indices = @transform_0, window_bounds = array<i64: 1, 4, 32, 128>}, {transform_indices = @transform_1, window_bounds = array<i64: 1, 32, 128>}, {transform_indices = @transform_2, window_bounds = array<i64: 1, 8, 128>}]} {
    %c0_i32 = arith.constant 0 : i32
    %0 = arith.cmpi eq, %arg1, %c0_i32 : i32
    %1 = arith.extui %0 : i1 to i32
    %c0_i32_0 = arith.constant 0 : i32
    %2 = arith.cmpi ne, %1, %c0_i32_0 : i32
    scf.if %2 {
      %cst_33 = arith.constant 0.000000e+00 : f32
      %61 = vector.broadcast %cst_33 : f32 to vector<8x128xf32>
      %c0_34 = arith.constant 0 : index
      %c0_35 = arith.constant 0 : index
      %62 = vector.load %arg5[%c0_34, %c0_35] : memref<8x128xf32, #tpu.memory_space<vmem>>, vector<8x128xf32>
      tpu.vector_store %arg5[%c0_34, %c0_35], %61 {strides = array<i32>} : memref<8x128xf32, #tpu.memory_space<vmem>>, vector<8x128xf32>,
      %cst_36 = arith.constant 0.000000e+00 : f32
      %63 = vector.broadcast %cst_36 : f32 to vector<8x128xf32>
      %c0_37 = arith.constant 0 : index
      %c0_38 = arith.constant 0 : index
      %64 = vector.load %arg6[%c0_37, %c0_38] : memref<8x128xf32, #tpu.memory_space<vmem>>, vector<8x128xf32>
      tpu.vector_store %arg6[%c0_37, %c0_38], %63 {strides = array<i32>} : memref<8x128xf32, #tpu.memory_space<vmem>>, vector<8x128xf32>,
      %cst_39 = arith.constant 0.000000e+00 : f32
      %65 = vector.broadcast %cst_39 : f32 to vector<8x128xf32>
      %c0_40 = arith.constant 0 : index
      %c0_41 = arith.constant 0 : index
      %66 = vector.load %arg7[%c0_40, %c0_41] : memref<8x128xf32, #tpu.memory_space<vmem>>, vector<8x128xf32>
      tpu.vector_store %arg7[%c0_40, %c0_41], %65 {strides = array<i32>} : memref<8x128xf32, #tpu.memory_space<vmem>>, vector<8x128xf32>,
    } else {
    }
    %c0 = arith.constant 0 : index
    %c0_1 = arith.constant 0 : index
    %c0_2 = arith.constant 0 : index
    %c0_3 = arith.constant 0 : index
    %3 = vector.load %arg2[%c0, %c0_1, %c0_2, %c0_3] : memref<1x4x32x128xf32, #tpu.memory_space<vmem>>, vector<1x1x32x128xf32>
    %4 = vector.shape_cast %3 : vector<1x1x32x128xf32> to vector<32x128xf32>
    %c0_4 = arith.constant 0 : index
    %c1 = arith.constant 1 : index
    %c0_5 = arith.constant 0 : index
    %c0_6 = arith.constant 0 : index
    %5 = vector.load %arg2[%c0_4, %c1, %c0_5, %c0_6] : memref<1x4x32x128xf32, #tpu.memory_space<vmem>>, vector<1x1x32x128xf32>
    %6 = vector.shape_cast %5 : vector<1x1x32x128xf32> to vector<32x128xf32>
    %c0_7 = arith.constant 0 : index
    %c2 = arith.constant 2 : index
    %c0_8 = arith.constant 0 : index
    %c0_9 = arith.constant 0 : index
    %7 = vector.load %arg2[%c0_7, %c2, %c0_8, %c0_9] : memref<1x4x32x128xf32, #tpu.memory_space<vmem>>, vector<1x1x32x128xf32>
    %8 = vector.shape_cast %7 : vector<1x1x32x128xf32> to vector<32x128xf32>
    %c0_10 = arith.constant 0 : index
    %c3 = arith.constant 3 : index
    %c0_11 = arith.constant 0 : index
    %c0_12 = arith.constant 0 : index
    %9 = vector.load %arg2[%c0_10, %c3, %c0_11, %c0_12] : memref<1x4x32x128xf32, #tpu.memory_space<vmem>>, vector<1x1x32x128xf32>
    %10 = vector.shape_cast %9 : vector<1x1x32x128xf32> to vector<32x128xf32>
    %11 = arith.maximumf %4, %6 : vector<32x128xf32>
    %12 = arith.maximumf %11, %8 : vector<32x128xf32>
    %13 = arith.maximumf %12, %10 : vector<32x128xf32>
    %14 = arith.subf %4, %13 : vector<32x128xf32>
    %15 = math.exp %14 : vector<32x128xf32>
    %16 = arith.subf %6, %13 : vector<32x128xf32>
    %17 = math.exp %16 : vector<32x128xf32>
    %18 = arith.addf %15, %17 : vector<32x128xf32>
    %19 = arith.subf %8, %13 : vector<32x128xf32>
    %20 = math.exp %19 : vector<32x128xf32>
    %21 = arith.addf %18, %20 : vector<32x128xf32>
    %22 = arith.subf %10, %13 : vector<32x128xf32>
    %23 = math.exp %22 : vector<32x128xf32>
    %24 = arith.addf %21, %23 : vector<32x128xf32>
    %25 = tpu.reciprocal %24 : vector<32x128xf32> -> vector<32x128xf32>
    %26 = arith.mulf %17, %25 : vector<32x128xf32>
    %27 = tpu.iota {dimensions = array<i32: 0>} : vector<32x128xi32>
    %28 = tpu.iota {dimensions = array<i32: 1>} : vector<32x128xi32>
    %c32_i32 = arith.constant 32 : i32
    %29 = arith.muli %arg1, %c32_i32 : i32
    %30 = vector.broadcast %29 : i32 to vector<32x128xi32>
    %31 = arith.addi %30, %27 : vector<32x128xi32>
    %c128_i32 = arith.constant 128 : i32
    %32 = vector.broadcast %c128_i32 : i32 to vector<32x128xi32>
    %33 = arith.muli %31, %32 : vector<32x128xi32>
    %34 = arith.addi %33, %28 : vector<32x128xi32>
    %c256_i32 = arith.constant 256 : i32
    %35 = vector.broadcast %c256_i32 : i32 to vector<32x128xi32>
    %36 = arith.cmpi slt, %34, %35 : vector<32x128xi32>
    %cst = arith.constant 0.000000e+00 : f32
    %37 = vector.broadcast %cst : f32 to vector<32x128xf32>
    %38 = arith.select %36, %26, %37 : vector<32x128xi1>, vector<32x128xf32>
    %c0_13 = arith.constant 0 : index
    %c0_14 = arith.constant 0 : index
    %c0_15 = arith.constant 0 : index
    %39 = vector.load %arg3[%c0_13, %c0_14, %c0_15] : memref<1x32x128xi8, #tpu.memory_space<vmem>>, vector<1x32x128xi8>
    %40 = vector.shape_cast %39 : vector<1x32x128xi8> to vector<32x128xi8>
    %41 = arith.sitofp %40 : vector<32x128xi8> to vector<32x128xf32>
    %c0_16 = arith.constant 0 : index
    %c0_17 = arith.constant 0 : index
    %42 = vector.load %arg5[%c0_16, %c0_17] : memref<8x128xf32, #tpu.memory_space<vmem>>, vector<8x128xf32>
    %43 = arith.mulf %38, %41 : vector<32x128xf32>
    %44 = vector.shape_cast %43 : vector<32x128xf32> to vector<4x8x128xf32>
    %cst_18 = arith.constant dense<0.000000e+00> : vector<8x128xf32>
    %45 = vector.multi_reduction <add>, %44, %cst_18 [0] : vector<4x8x128xf32> to vector<8x128xf32>
    %46 = arith.addf %42, %45 : vector<8x128xf32>
    %c0_19 = arith.constant 0 : index
    %c0_20 = arith.constant 0 : index
    %47 = vector.load %arg5[%c0_19, %c0_20] : memref<8x128xf32, #tpu.memory_space<vmem>>, vector<8x128xf32>
    tpu.vector_store %arg5[%c0_19, %c0_20], %46 {strides = array<i32>} : memref<8x128xf32, #tpu.memory_space<vmem>>, vector<8x128xf32>,
    %c0_21 = arith.constant 0 : index
    %c0_22 = arith.constant 0 : index
    %48 = vector.load %arg6[%c0_21, %c0_22] : memref<8x128xf32, #tpu.memory_space<vmem>>, vector<8x128xf32>
    %49 = vector.shape_cast %38 : vector<32x128xf32> to vector<4x8x128xf32>
    %cst_23 = arith.constant dense<0.000000e+00> : vector<8x128xf32>
    %50 = vector.multi_reduction <add>, %49, %cst_23 [0] : vector<4x8x128xf32> to vector<8x128xf32>
    %51 = arith.addf %48, %50 : vector<8x128xf32>
    %c0_24 = arith.constant 0 : index
    %c0_25 = arith.constant 0 : index
    %52 = vector.load %arg6[%c0_24, %c0_25] : memref<8x128xf32, #tpu.memory_space<vmem>>, vector<8x128xf32>
    tpu.vector_store %arg6[%c0_24, %c0_25], %51 {strides = array<i32>} : memref<8x128xf32, #tpu.memory_space<vmem>>, vector<8x128xf32>,
    %c0_26 = arith.constant 0 : index
    %c0_27 = arith.constant 0 : index
    %53 = vector.load %arg7[%c0_26, %c0_27] : memref<8x128xf32, #tpu.memory_space<vmem>>, vector<8x128xf32>
    %54 = vector.shape_cast %41 : vector<32x128xf32> to vector<4x8x128xf32>
    %cst_28 = arith.constant dense<0.000000e+00> : vector<8x128xf32>
    %55 = vector.multi_reduction <add>, %54, %cst_28 [0] : vector<4x8x128xf32> to vector<8x128xf32>
    %56 = arith.addf %53, %55 : vector<8x128xf32>
    %c0_29 = arith.constant 0 : index
    %c0_30 = arith.constant 0 : index
    %57 = vector.load %arg7[%c0_29, %c0_30] : memref<8x128xf32, #tpu.memory_space<vmem>>, vector<8x128xf32>
    tpu.vector_store %arg7[%c0_29, %c0_30], %56 {strides = array<i32>} : memref<8x128xf32, #tpu.memory_space<vmem>>, vector<8x128xf32>,
    %c0_i32_31 = arith.constant 0 : i32
    %58 = arith.cmpi eq, %arg1, %c0_i32_31 : i32
    %59 = arith.extui %58 : i1 to i32
    %c0_i32_32 = arith.constant 0 : i32
    %60 = arith.cmpi ne, %59, %c0_i32_32 : i32
    scf.if %60 {
      %c0_33 = arith.constant 0 : index
      %c0_34 = arith.constant 0 : index
      %61 = vector.load %arg5[%c0_33, %c0_34] : memref<8x128xf32, #tpu.memory_space<vmem>>, vector<8x128xf32>
      %62 = vector.shape_cast %61 : vector<8x128xf32> to vector<1x8x128xf32>
      %cst_35 = arith.constant dense<0.000000e+00> : vector<1xf32>
      %63 = vector.multi_reduction <add>, %62, %cst_35 [1, 2] : vector<1x8x128xf32> to vector<1xf32>
      %64 = vector.shape_cast %63 : vector<1xf32> to vector<1x1x1xf32>
      %65 = vector.extract %64[0, 0, 0] : f32 from vector<1x1x1xf32>
      %c0_36 = arith.constant 0 : index
      %c0_37 = arith.constant 0 : index
      %66 = vector.load %arg6[%c0_36, %c0_37] : memref<8x128xf32, #tpu.memory_space<vmem>>, vector<8x128xf32>
      %67 = vector.shape_cast %66 : vector<8x128xf32> to vector<1x8x128xf32>
      %cst_38 = arith.constant dense<0.000000e+00> : vector<1xf32>
      %68 = vector.multi_reduction <add>, %67, %cst_38 [1, 2] : vector<1x8x128xf32> to vector<1xf32>
      %69 = vector.shape_cast %68 : vector<1xf32> to vector<1x1x1xf32>
      %70 = vector.extract %69[0, 0, 0] : f32 from vector<1x1x1xf32>
      %c0_39 = arith.constant 0 : index
      %c0_40 = arith.constant 0 : index
      %71 = vector.load %arg7[%c0_39, %c0_40] : memref<8x128xf32, #tpu.memory_space<vmem>>, vector<8x128xf32>
      %72 = vector.shape_cast %71 : vector<8x128xf32> to vector<1x8x128xf32>
      %cst_41 = arith.constant dense<0.000000e+00> : vector<1xf32>
      %73 = vector.multi_reduction <add>, %72, %cst_41 [1, 2] : vector<1x8x128xf32> to vector<1xf32>
      %74 = vector.shape_cast %73 : vector<1xf32> to vector<1x1x1xf32>
      %75 = vector.extract %74[0, 0, 0] : f32 from vector<1x1x1xf32>
      %cst_42 = arith.constant 2.000000e+00 : f32
      %76 = arith.mulf %cst_42, %65 : f32
      %cst_43 = arith.constant 1.000000e+00 : f32
      %77 = arith.addf %76, %cst_43 : f32
      %78 = arith.addf %70, %75 : f32
      %cst_44 = arith.constant 1.000000e+00 : f32
      %79 = arith.addf %78, %cst_44 : f32
      %80 = arith.divf %77, %79 : f32
      %cst_45 = arith.constant 1.000000e+00 : f32
      %81 = arith.subf %cst_45, %80 : f32
      %82 = vector.broadcast %81 : f32 to vector<1x8x128xf32>
      %c0_46 = arith.constant 0 : index
      %c0_47 = arith.constant 0 : index
      %c0_48 = arith.constant 0 : index
      %83 = vector.load %arg4[%c0_46, %c0_47, %c0_48] : memref<1x8x128xf32, #tpu.memory_space<vmem>>, vector<1x8x128xf32>
      tpu.vector_store %arg4[%c0_46, %c0_47, %c0_48], %82 {strides = array<i32>} : memref<1x8x128xf32, #tpu.memory_space<vmem>>, vector<1x8x128xf32>,
    } else {
    }
    return
  }
  func.func @transform_0(%arg0: i32, %arg1: i32) -> (i32, i32, i32, i32) {
    %c0_i32 = arith.constant 0 : i32
    %c0_i32_0 = arith.constant 0 : i32
    %c0_i32_1 = arith.constant 0 : i32
    return %arg0, %c0_i32, %arg1, %c0_i32_0 : i32, i32, i32, i32
  }
  func.func @transform_1(%arg0: i32, %arg1: i32) -> (i32, i32, i32) {
    %c0_i32 = arith.constant 0 : i32
    %c0_i32_0 = arith.constant 0 : i32
    return %arg0, %arg1, %c0_i32 : i32, i32, i32
  }
  func.func @transform_2(%arg0: i32, %arg1: i32) -> (i32, i32, i32) {
    %c0_i32 = arith.constant 0 : i32
    %c0_i32_0 = arith.constant 0 : i32
    %c0_i32_1 = arith.constant 0 : i32
    return %arg0, %c0_i32, %c0_i32_0 : i32, i32, i32
  }
}

</mosaic_0001>

<bundles_post_ra>
// kernel: tpu_custom_call.1
= control target key start
LH: loop header
LB: loop body
LE: loop exit
PB: predicated region body
PF: predicated region fallthrough
CT: control target
= control target key end

     0   :  { %7 = vsyncpa [#allocation6], 0  ;;  %s1065_s0 = inlined_call_operand.hbm [shape: f32[2,4,32,128], index: 0, kind: input, shape index: {}]   ;;  %s1066_s1 = inlined_call_operand.hbm [shape: s8[2,32,128], index: 1, kind: input, shape index: {}]   ;;  %s1067_s2 = inlined_call_operand.hbm [shape: f32[2,8,128], index: 2, kind: output, shape index: {}]  }
   0x1   :  { %9 = vsyncpa [#allocation6 + $0x1], 0 }
   0x2   :  { %10 = vsyncpa [#allocation9], 0 }
   0x3   :  { %12 = vsyncpa [#allocation9 + $0x1], 0 }
   0x4   :  { %13 = vsyncpa [#allocation7], 0 }
   0x5   :  { %15 = vsyncpa [#allocation7 + $0x1], 0  ;;  %s859_s9 = smov 0   ;;  %s861_s10 = smov 0  }
   0x6   :  { %s863_s11 = smov 0   ;;  %s865_s12 = smov 0  }
   0x7   :  { %s867_s13 = smov 0   ;;  %s869_s14 = smov 0  }
   0x8 LB: > { %s548_s15 = sadd.s32 4294967295, %s837_s14   ;;  %s549_s16 = sadd.s32 4294967294, %s837_s14   ;;  %s837_s14 = sphi %s869_s14, %s21_s14   ;;  %s833_s13 = sphi %s867_s13, %s1078_s13   ;;  %s829_s12 = sphi %s865_s12, %s1077_s12   ;;  %s825_s11 = sphi %s863_s11, %s1076_s11   ;;  %s821_s10 = sphi %s861_s10, %s1075_s10   ;;  %s817_s9 = sphi %s859_s9, %s1074_s9  }
   0x9   : > { %s33_s17 = sadd.s32 1, %s833_s13  ;;  %s42_s18 = sadd.s32 1, %s825_s11 }
   0xa   : > { %p35_p0 = scmp.ge.s32.totalorder %s33_s17, 2  ;;  %p49_p1 = scmp.ne.s32.totalorder %s825_s11, %s821_s10 }
   0xb   : > { %p50_p2 = scmp.eq.s32.totalorder %s837_s14, 0  ;;  %p55_p3 = scmp.ne.s32.totalorder %s821_s10, %s817_s9 }
   0xc   : > { %s1080_s17 = smov (%p35_p0, %s33_s17), 0  ;;  %p56_p5 = scmp.eq.s32.totalorder %s548_s15, 0 }
   0xd   : > { %p900_p4 = por %p50_p2, %p49_p1  ;;  %s37_s20 = ssub.s32 %s833_s13, %s1080_s17 }
   0xe   : > { %p107_p6 = scmp.eq.s32.totalorder %s548_s15, 1  ;;  %p40_p7 = scmp.eq.s32.totalorder %s37_s20, 0 }
   0xf   : > { %p906_p8 = por %p56_p5, %p55_p3  ;;  %p113_p10 = scmp.eq.s32.totalorder %s549_s16, 1 }
  0x10   : > { %p910_p9 = por %p107_p6, %p49_p1  ;;  %p551_p12 = scmp.ge.s32.totalorder %s837_s14, 2 }
  0x11   : > { %s915_s23 = scalar_select %p40_p7, %s825_s11, %s42_s18  }
  0x12   : > { %p917_p11 = por %p113_p10, %p55_p3  ;;  %p603_p13 = scmp.lt.s32.totalorder %s837_s14, 2 }
  0x13   : > { %s924_s25 = sand.u32 1, %s825_s11   ;;  %s577_s27 = sshll.u32 %s833_s13, 11 }
  0x14   : > { %s552_s26 = sshll.u32 %s924_s25, 7  ;;  %s145_s30 = scalar_lea.hbm %s1065_s0, %s577_s27 }
  0x15   : > { %s137_s3 = scalar_lea.vmem [#allocation5], %s552_s26  ;;  %p933_p0 = pnand %p603_p13, %p900_p4 }
  0x16   : > { %s146_s4 = sshll.u32 %s137_s3, 4  ;;  %p557_p1 = scmp.ge.s32.totalorder %s837_s14, 1  ;;  %s147_s4 = int_to_ptr.vmem [resolvable:$true] %s146_s4 }
  0x17   : > { %s134_s6 = scalar_lea.sflag [#allocation6], %s924_s25  ;;  %p699_p2 = pneg %p933_p0 }
  0x18   : > { %s710_s7 = scalar_lea.vmem %s147_s4, 2048  ;;  %s839_s8 = smov [#allocation5]  }
  0x19   : > { %p711_p3 = scmp.ne.s32.totalorder %s147_s4, %s710_s7  ;;  %s715_s15 = sshll.u32 %s839_s8, 4  ;;  %s716_s15 = int_to_ptr.vmem [resolvable:$false] %s715_s15 }
  0x1a   : > { %s717_s16 = scalar_lea.vmem %s716_s15, 4096  ;;  %p718_p4 = scmp.lt.s32.totalorder %s147_s4, %s716_s15 }
  0x1b   : > { %p713_p5 = pnand %p711_p3, %p699_p2  ;;  %p719_p7 = scmp.lt.s32.totalorder %s717_s16, %s710_s7 }
  0x1d   : > { %p714_p6 = pneg %p713_p5  ;;  %p720_p10 = por %p719_p7, %p718_p4 }
  0x1f   : > { %p721_p13 = pnand %p720_p10, %p714_p6 }
  0x21   : > { %724 = shalt.err (!%p721_p13)
}
  0x22   : > { %s840_s18 = smov 128   ;;  %s841_s19 = smov 8  }
  0x23   : > { %595 = dma.hbm_to_vmem [thread:$0]  (!%p933_p0), %s145_s30, 2048, %s147_s4, %s134_s6, %s840_s18, %s840_s18, %s841_s19  }
  0x24   : > { %p173_p3 = scmp.lt.s32.totalorder %s837_s14, 3  ;;  %s555_s20 = sshll.u32 %s924_s25, 3 }
  0x25   : > { %s556_s26 = sshll.u32 %s833_s13, 7  ;;  %s160_s7 = scalar_lea.vmem [#allocation8], %s555_s20 }
  0x26   : > { %p951_p5 = pnand %p557_p1, %p173_p3  ;;  %s166_s3 = scalar_lea.hbm %s1066_s1, %s556_s26 }
  0x27   : > { %s168_s8 = sshll.u32 %s160_s7, 4  ;;  %s157_s15 = scalar_lea.sflag [#allocation9], %s924_s25  ;;  %s169_s8 = int_to_ptr.vmem [resolvable:$true] %s168_s8 }
  0x28   : > { %s738_s16 = scalar_lea.vmem %s169_s8, 128  ;;  %s842_s30 = smov [#allocation8]  }
  0x29   : > { %p739_p6 = scmp.ne.s32.totalorder %s169_s8, %s738_s16  ;;  %s743_s4 = sshll.u32 %s842_s30, 4  ;;  %s744_s4 = int_to_ptr.vmem [resolvable:$false] %s743_s4 }
  0x2a   : > { %s745_s6 = scalar_lea.vmem %s744_s4, 256  ;;  %p746_p1 = scmp.lt.s32.totalorder %s169_s8, %s744_s4 }
  0x2b   : > { %p741_p4 = pnand %p739_p6, %p699_p2  ;;  %p747_p10 = scmp.lt.s32.totalorder %s745_s6, %s738_s16 }
  0x2d   : > { %p742_p7 = pneg %p741_p4  ;;  %p748_p13 = por %p747_p10, %p746_p1 }
  0x2f   : > { %p749_p3 = pnand %p748_p13, %p742_p7 }
  0x31   : > { %752 = shalt.err (!%p749_p3)
}
  0x32   : > { %598 = dma.hbm_to_vmem [thread:$0]  (!%p933_p0), %s166_s3, 128, %s169_s8, %s157_s15  }
  0x33   : > { %177 = sbr.rel (%p951_p5) target bundleno = 419 (0x1a3), region = 28  ;;  %s967_s25 = sand.u32 (!%p951_p5), 1, %s821_s10  }
  0x34   : > { %s558_s18 = sshll.u32 (!%p951_p5), %s967_s25, 7  ;;  %s180_s19 = scalar_lea.sflag (!%p951_p5), [#allocation6], %s967_s25 }
  0x35   : > { %s971_s20 = scalar_lea.vmem (!%p951_p5), [#allocation5], %s558_s18 }
  0x38   : > { %804 = dma.done.wait (%p906_p8), %s180_s19, 2048  }
  0x39   : > { %806 = vsyncadd (%p906_p8), %s180_s19, 4294965248  ;;  %s559_s5 = sshll.u32 %s967_s25, 3  ;;  %s189_s26 = scalar_lea.sflag [#allocation9], %s967_s25 }
  0x3a   : > { %s192_s27 = scalar_lea.vmem [#allocation8], %s559_s5 }
  0x3b   : > { %808 = dma.done.wait (%p906_p8), %s189_s26, 128  }
  0x3c   : > { %810 = vsyncadd (%p906_p8), %s189_s26, 4294967168  ;;  %v354_v0 = vld [vmem:[%s192_s27] sm:$0xff]  ;;  %v228_v7 = vld [vmem:[%s971_s20 + $0x10] sm:$0xff]  ;;  %s574_s30 = sshll.u32 %s829_s12, 7  ;;  %s217_s6 = scalar_lea.vmem [#allocation10], %s559_s5 }
  0x3d   : > { %v226_v1 = vld [vmem:[%s971_s20] sm:$0xff]  ;;  %v227_v2 = vld [vmem:[%s971_s20 + $0x8] sm:$0xff]  ;;  %v355_v3 = vunpack.c.0.s8 %v354_v0  ;;  %v356_v4 = vunpack.c.1.s8 %v354_v0  ;;  %v357_v5 = vunpack.c.2.s8 %v354_v0  ;;  %v358_v6 = vunpack.c.3.s8 %v354_v0  ;;  %v229_v8 = vld [vmem:[%s971_s20 + $0x18] sm:$0xff]  ;;  %s443_s18 = sshll.u32 %s217_s6, 4  ;;  %s1023_s27 = scalar_lea.hbm %s1067_s2, %s574_s30  ;;  %s444_s18 = int_to_ptr.vmem [resolvable:$true] %s443_s18 }
  0x3e   : > { %v561_v9 = vld [vmem:[%s971_s20 + $0x20] sm:$0xff]  ;;  %v562_v10 = vld [vmem:[%s971_s20 + $0x28] sm:$0xff]  ;;  %v563_v11 = vld [vmem:[%s971_s20 + $0x30] sm:$0xff]  ;;  %s843_s12 = smov [#allocation10]  }
  0x3f   : > { %v564_v12 = vld [vmem:[%s971_s20 + $0x38] sm:$0xff]  ;;  %v245_v13 = vmax.f32 %v226_v1, %v561_v9  ;;  %v993_v14 = vcvt.s32.f32 %v355_v3  ;;  %v995_v15 = vcvt.s32.f32 %v356_v4  ;;  %v997_v16 = vcvt.s32.f32 %v357_v5  ;;  %v565_v17 = vld [vmem:[%s971_s20 + $0x40] sm:$0xff]  ;;  %v566_v18 = vld [vmem:[%s971_s20 + $0x48] sm:$0xff] }
  0x40   : > { %v567_v19 = vld [vmem:[%s971_s20 + $0x50] sm:$0xff]  ;;  %v568_v20 = vld [vmem:[%s971_s20 + $0x58] sm:$0xff]  ;;  %v569_v21 = vld [vmem:[%s971_s20 + $0x60] sm:$0xff]  ;;  %v246_v22 = vmax.f32 %v227_v2, %v562_v10  ;;  %v247_v23 = vmax.f32 %v228_v7, %v563_v11  ;;  %v248_v24 = vmax.f32 %v229_v8, %v564_v12  ;;  %v1004_v26 = vcvt.s32.f32 %v358_v6 }
  0x41   : > { %v249_v25 = vmax.f32 %v245_v13, %v565_v17  ;;  %v380_v27 = vadd.f32 %v995_v15, %v993_v14  ;;  %v570_v28 = vld [vmem:[%s971_s20 + $0x68] sm:$0xff]  ;;  %v571_v29 = vld [vmem:[%s971_s20 + $0x70] sm:$0xff]  ;;  %v572_v30 = vld [vmem:[%s971_s20 + $0x78] sm:$0xff] }
  0x42   : > { %v250_v31 = vmax.f32 %v246_v22, %v566_v18  ;;  %v251_v32 = vmax.f32 %v247_v23, %v567_v19  ;;  %v252_v33 = vmax.f32 %v248_v24, %v568_v20 }
  0x43   : > { %v253_v34 = vmax.f32 %v249_v25, %v569_v21  ;;  %v381_v35 = vadd.f32 %v380_v27, %v997_v16  ;;  %v325_v27 = vlaneseq }
  0x44   : > { %v254_v36 = vmax.f32 %v250_v31, %v570_v28  ;;  %v255_v37 = vmax.f32 %v251_v32, %v571_v29  ;;  %v256_v38 = vmax.f32 %v252_v33, %v572_v30 }
  0x45   : > { %v257_v39 = vsub.f32 %v226_v1, %v253_v34  ;;  %v382_v40 = vadd.f32 %v381_v35, %v1004_v26  ;;  %v269_v41 = vsub.f32 %v561_v9, %v253_v34  ;;  %v285_v42 = vsub.f32 %v565_v17, %v253_v34 }
  0x46   : > { %v258_v43 = vsub.f32 %v227_v2, %v254_v36  ;;  %v259_v44 = vsub.f32 %v228_v7, %v255_v37  ;;  %v260_v45 = vsub.f32 %v229_v8, %v256_v38  ;;  %v270_v47 = vsub.f32 %v562_v10, %v254_v36 }
  0x47   : > { %v261_v46 = vmul.f32 1.442695, %v257_v39  ;;  %409 = vadd.xlane.f32.xlu1 %v382_v40  ;;  %v271_v48 = vsub.f32 %v563_v11, %v255_v37  ;;  %v272_v49 = vsub.f32 %v564_v12, %v256_v38  ;;  %v273_v50 = vmul.f32 1.442695, %v269_v41 }
  0x48   : > { %v263_v51 = vmul.f32 1.442695, %v258_v43  ;;  %v265_v52 = vmul.f32 1.442695, %v259_v44  ;;  %v267_v53 = vmul.f32 1.442695, %v260_v45  ;;  %v286_v56 = vsub.f32 %v566_v18, %v254_v36 }
  0x49   : > { %655 = vpow2.f32 %v261_v46  ;;  %v275_v54 = vmul.f32 1.442695, %v270_v47  ;;  %v277_v55 = vmul.f32 1.442695, %v271_v48  ;;  %v287_v57 = vsub.f32 %v567_v19, %v255_v37 }
  0x4a   : > { %657 = vpow2.f32 %v273_v50  ;;  %v279_v58 = vmul.f32 1.442695, %v272_v49  ;;  %v288_v59 = vsub.f32 %v568_v20, %v256_v38  ;;  %v289_v60 = vmul.f32 1.442695, %v285_v42 }
  0x4b   : > { %659 = vpow2.f32 %v263_v51  ;;  %v301_v61 = vsub.f32 %v569_v21, %v253_v34  ;;  %v291_v62 = vmul.f32 1.442695, %v286_v56  ;;  %v302_v63 = vsub.f32 %v570_v28, %v254_v36 }
  0x4c   : > { %661 = vpow2.f32 %v265_v52  ;;  %v293_v0 = vmul.f32 1.442695, %v287_v57  ;;  %v303_v1 = vsub.f32 %v571_v29, %v255_v37  ;;  %v295_v2 = vmul.f32 1.442695, %v288_v59 }
  0x4d   : > { %663 = vpow2.f32 %v267_v53  ;;  %v304_v3 = vsub.f32 %v572_v30, %v256_v38  ;;  %v305_v4 = vmul.f32 1.442695, %v301_v61  ;;  %v307_v5 = vmul.f32 1.442695, %v302_v63 }
  0x4e   : > { %665 = vpow2.f32 %v275_v54  ;;  %v309_v6 = vmul.f32 1.442695, %v303_v1  ;;  %v326_v36 = vshrl.u32 %v325_v27, 7  ;;  %v331_v45 = vand.u32 127, %v325_v27 }
  0x4f   : > { %667 = vpow2.f32 %v277_v55  ;;  %v311_v7 = vmul.f32 1.442695, %v304_v3 }
  0x50   : > { %669 = vpow2.f32 %v279_v58  ;;  %v327_v42 = vadd.s32 8, %v326_v36  ;;  %v328_v43 = vadd.s32 16, %v326_v36  ;;  %v329_v44 = vadd.s32 24, %v326_v36 }
  0x51   : > { %671 = vpow2.f32 %v289_v60  ;;  %v338_v46 = vmul.u32 128, %v326_v36 }
  0x52   : > { %673 = vpow2.f32 %v291_v62  ;;  %v339_v47 = vmul.u32 128, %v327_v42  ;;  %v340_v48 = vmul.u32 128, %v328_v43 }
  0x53   : > { %675 = vpow2.f32 %v293_v0  ;;  %v341_v49 = vmul.u32 128, %v329_v44  ;;  %v342_v50 = vadd.s32 %v338_v46, %v331_v45 }
  0x54   : > { %677 = vpow2.f32 %v295_v2  ;;  %v343_v51 = vadd.s32 %v339_v47, %v331_v45  ;;  %v344_v52 = vadd.s32 %v340_v48, %v331_v45 }
  0x55   : > { %679 = vpow2.f32 %v305_v4  ;;  %v345_v53 = vadd.s32 %v341_v49, %v331_v45  ;;  %vm346_vm0 = vcmp.lt.s32.totalorder %v342_v50, 256 }
  0x56   : > { %v656_v8 = vpop.eup %655  ;;  %681 = vpow2.f32 %v307_v5  ;;  %vm347_vm1 = vcmp.lt.s32.totalorder %v343_v51, 256  ;;  %vm348_vm2 = vcmp.lt.s32.totalorder %v344_v52, 256 }
  0x57   : > { %v658_v9 = vpop.eup %657  ;;  %683 = vpow2.f32 %v309_v6  ;;  %vm349_vm3 = vcmp.lt.s32.totalorder %v345_v53, 256 }
  0x58   : > { %v660_v10 = vpop.eup %659  ;;  %685 = vpow2.f32 %v311_v7  ;;  %v281_v17 = vadd.f32 %v658_v9, %v656_v8 }
  0x59   : > { %v662_v11 = vpop.eup %661 }
  0x5a   : > { %v664_v12 = vpop.eup %663 }
  0x5b   : > { %v666_v13 = vpop.eup %665 }
  0x5c   : > { %v668_v18 = vpop.eup %667  ;;  %v282_v19 = vadd.f32 %v666_v13, %v660_v10 }
  0x5d   : > { %v670_v20 = vpop.eup %669  ;;  %v283_v21 = vadd.f32 %v668_v18, %v662_v11 }
  0x5e   : > { %v672_v22 = vpop.eup %671  ;;  %v284_v23 = vadd.f32 %v670_v20, %v664_v12 }
  0x5f   : > { %v674_v24 = vpop.eup %673  ;;  %v297_v25 = vadd.f32 %v672_v22, %v281_v17 }
  0x60   : > { %v676_v28 = vpop.eup %675  ;;  %v298_v29 = vadd.f32 %v674_v24, %v282_v19 }
  0x61   : > { %v678_v30 = vpop.eup %677  ;;  %v299_v31 = vadd.f32 %v676_v28, %v283_v21 }
  0x62   : > { %v680_v32 = vpop.eup %679  ;;  %v300_v33 = vadd.f32 %v678_v30, %v284_v23 }
  0x63   : > { %v682_v34 = vpop.eup %681  ;;  %v313_v35 = vadd.f32 %v680_v32, %v297_v25 }
  0x64   : > { %v684_v37 = vpop.eup %683  ;;  %v314_v38 = vadd.f32 %v682_v34, %v298_v29 }
  0x65   : > { %v686_v39 = vpop.eup %685  ;;  %v315_v40 = vadd.f32 %v684_v37, %v299_v31  ;;  %687 = vrcp.f32 %v313_v35 }
  0x66   : > { %v316_v41 = vadd.f32 %v686_v39, %v300_v33  ;;  %689 = vrcp.f32 %v314_v38 }
  0x67   : > { %691 = vrcp.f32 %v315_v40 }
  0x68   : > { %693 = vrcp.f32 %v316_v41 }
  0x72   : > { %v688_v54 = vpop.eup %687 }
  0x73   : > { %v690_v55 = vpop.eup %689  ;;  %v321_v56 = vmul.f32 %v688_v54, %v658_v9 }
  0x74   : > { %v692_v57 = vpop.eup %691  ;;  %v322_v58 = vmul.f32 %v690_v55, %v666_v13 }
  0x75   : > { %v694_v59 = vpop.eup %693  ;;  %v323_v60 = vmul.f32 %v692_v57, %v668_v18  ;;  %v350_v61 = vsel %vm346_vm0, %v321_v56, 0.0 }
  0x76   : > { %v324_v62 = vmul.f32 %v694_v59, %v670_v20  ;;  %v351_v63 = vsel %vm347_vm1, %v322_v58, 0.0  ;;  %v364_v0 = vmul.f32 %v993_v14, %v350_v61 }
  0x77   : > { %v352_v1 = vsel %vm348_vm2, %v323_v60, 0.0  ;;  %v365_v2 = vmul.f32 %v995_v15, %v351_v63  ;;  %v374_v3 = vadd.f32 %v351_v63, %v350_v61 }
  0x78   : > { %v353_v4 = vsel %vm349_vm3, %v324_v62, 0.0  ;;  %v366_v5 = vmul.f32 %v997_v16, %v352_v1 }
  0x79   : > { %v367_v6 = vmul.f32 %v1004_v26, %v353_v4  ;;  %v368_v7 = vadd.f32 %v365_v2, %v364_v0  ;;  %v375_v9 = vadd.f32 %v374_v3, %v352_v1 }
  0x7b   : > { %v369_v8 = vadd.f32 %v368_v7, %v366_v5  ;;  %v376_v11 = vadd.f32 %v375_v9, %v353_v4 }
  0x7d   : > { %v370_v10 = vadd.f32 %v369_v8, %v367_v6 }
  0x7f   : > { %389 = vadd.xlane.f32.xlu0 %v370_v10 }
  0x83   : > { %399 = vadd.xlane.f32.xlu0 %v376_v11 }
  0xd0   : > { %v410_v12 = vpop.xlane.xlu1 %409 }
  0xd1   : > { %v411_v13 = vrot.slane %v410_v12, 4 }
  0xd3   : > { %v412_v17 = vadd.f32 %v411_v13, %v410_v12 }
  0xd5   : > { %v413_v15 = vrot.slane %v412_v17, 2 }
  0xd7   : > { %v414_v26 = vadd.f32 %v413_v15, %v412_v17 }
  0xd9   : > { %v415_v29 = vrot.slane %v414_v26, 1 }
  0xdb   : > { %v416_v32 = vadd.f32 %v415_v29, %v414_v26 }
 0x108   : > { %v390_v14 = vpop.xlane.xlu0 %389 }
 0x109   : > { %v391_v18 = vrot.slane %v390_v14, 4 }
 0x10b   : > { %v392_v19 = vadd.f32 %v391_v18, %v390_v14 }
 0x10c   : > { %v400_v20 = vpop.xlane.xlu0 %399 }
 0x10d   : > { %v393_v21 = vrot.slane %v392_v19, 2  ;;  %v401_v22 = vrot.slane %v400_v20, 4 }
 0x10f   : > { %v402_v16 = vadd.f32 %v401_v22, %v400_v20  ;;  %v394_v23 = vadd.f32 %v393_v21, %v392_v19 }
 0x111   : > { %v403_v24 = vrot.slane %v402_v16, 2  ;;  %v395_v25 = vrot.slane %v394_v23, 1 }
 0x113   : > { %v404_v27 = vadd.f32 %v403_v24, %v402_v16  ;;  %v396_v28 = vadd.f32 %v395_v25, %v394_v23 }
 0x115   : > { %578 = vpush %v396_v28  ;;  %v405_v30 = vrot.slane %v404_v27, 1 }
 0x117   : > { %v406_v31 = vadd.f32 %v405_v30, %v404_v27 }
 0x119   : > { %580 = vpush %v406_v31 }
 0x11a   : > { %582 = vpush %v416_v32 }
 0x146   : > { %s579_s21 = spop %578 }
 0x147   : > { %s418_s8 = smul.f32 2.0, %s579_s21  ;;  %s757_s21 = sshll.u32 %s843_s12, 4  ;;  %s758_s21 = int_to_ptr.vmem [resolvable:$false] %s757_s21 }
 0x148   : > { %s759_s5 = scalar_lea.vmem %s758_s21, 256  ;;  %p760_p5 = scmp.lt.s32.totalorder %s444_s18, %s758_s21 }
 0x149   : > { %s419_s15 = sadd.f32 1.0, %s418_s8 }
 0x14a   : > { %s581_s28 = spop %580 }
 0x14b   : > { %s583_s29 = spop %582 }
 0x14c   : > { %s420_s3 = sadd.f32 %s583_s29, %s581_s28  ;;  %s430_s28 = scalar_lea.sflag [#allocation7], %s967_s25 }
 0x14d   : > { %s753_s29 = scalar_lea.vmem %s444_s18, 128 }
 0x14e   : > { %s421_s7 = sadd.f32 1.0, %s420_s3  ;;  %p754_p8 = scmp.ne.s32.totalorder %s444_s18, %s753_s29 }
 0x14f   : > { %p761_p6 = scmp.lt.s32.totalorder %s759_s5, %s753_s29 }
 0x150   : > { %v422_v33 = vstv %s421_s7  ;;  %p755_p0 = pnand %p754_p8, %p910_p9 }
 0x151   : > { %695 = vrcp.f32 %v422_v33  ;;  %p762_p4 = por %p761_p6, %p760_p5 }
 0x152   : > { %p756_p2 = pneg %p755_p0 }
 0x154   : > { %p763_p7 = pnand %p762_p4, %p756_p2 }
 0x15e   : > { %v696_v34 = vpop.eup %695 }
 0x15f   : > { %584 = vpush %v696_v34 }
 0x190   : > { %s585_s16 = spop %584 }
 0x191   : > { %s425_s4 = smul.f32 %s585_s16, %s419_s15 }
 0x193   : > { %s426_s19 = ssub.f32 1.0, %s425_s4 }
 0x195   : > { %v427_v35 = vstv %s426_s19 }
 0x196   : > { %428 = vst [vmem:[%s217_s6] sm:$0xff] %v427_v35 }
 0x197   : > { %766 = shalt.err (!%p763_p7)
}
 0x198   : > { %s767_s3 = scalar_lea.hbm %s1023_s27, 128  ;;  %s771_s8 = scalar_lea.hbm %s1067_s2, 256 }
 0x199   : > { %p768_p1 = scmp.ne.s32.totalorder %s1023_s27, %s767_s3  ;;  %p772_p3 = scmp.lt.s32.totalorder %s1023_s27, %s1067_s2 }
 0x19a   : > { %p773_p8 = scmp.lt.s32.totalorder %s771_s8, %s767_s3 }
 0x19b   : > { %p769_p10 = pnand %p768_p1, %p910_p9 }
 0x19c   : > { %p774_p0 = por %p773_p8, %p772_p3 }
 0x19d   : > { %p770_p13 = pneg %p769_p10 }
 0x19f   : > { %p775_p2 = pnand %p774_p0, %p770_p13 }
 0x1a1   : > { %778 = shalt.err (!%p775_p2)
}
 0x1a2   : > { %590 = dma.vmem_to_hbm [thread:$0]  (%p910_p9), %s444_s18, 128, %s1023_s27, %s430_s28  }
 0x1a3 PF: > { %s455_s30 = sand.u32 1, %s817_s9   ;;  %p600_p5 = pnand %p551_p12, %p917_p11 }
 0x1a4   : > { %s456_s4 = scalar_lea.sflag [#allocation7], %s455_s30 }
 0x1a5   : > { %p601_p6 = pneg %p600_p5 }
 0x1a7   : > { %812 = dma.done.wait (%p601_p6), %s456_s4, 128  }
 0x1a8   : > { %814 = vsyncadd (%p601_p6), %s456_s4, 4294967168  ;;  %s21_s14 = sadd.s32 1, %s837_s14   ;;  %s1074_s9 = smov %s821_s10 }
 0x1a9   : > { %p18_p4 = scmp.ge.s32.totalorder %s21_s14, 4   ;;  %s1075_s10 = smov %s825_s11 }
 0x1aa   : > { %s1076_s11 = smov %s915_s23  ;;  %s1077_s12 = smov %s833_s13 }
 0x1ab   : > { %s1078_s13 = smov %s1080_s17  ;;  %20 = sbr.rel (!%p18_p4) target bundleno = 8 (0x8), region = 97 }
 0x1b0   :  { %461 = vsyncpa [#allocation6], 1 }
 0x1b1   :  { %463 = vsyncpa [#allocation6 + $0x1], 1 }
 0x1b2   :  { %464 = vsyncpa [#allocation9], 1 }
 0x1b3   :  { %466 = vsyncpa [#allocation9 + $0x1], 1 }
 0x1b4   :  { %467 = vsyncpa [#allocation7], 1 }
 0x1b5   :  { %469 = vsyncpa [#allocation7 + $0x1], 1 }

</bundles_post_ra>
